<compile_context>
chip_gen: v5e
topology: v5e:2x2
jax: 0.10.0
libtpu: 0.0.40
codegen_flags: <defaults>
</compile_context>

<pallas_src>
import jax
import jax.numpy as jnp
from jax.experimental import pallas as pl
from jax.experimental.pallas import tpu as pltpu

OBS_NUM = 2 + 1   # 3
ACT_NUM = 3
HIDDEN = 32
LANE = 128


def _round_up(n, m):
    return ((n + m - 1) // m) * m


def _mlp_kernel(x_ref, w1_ref, w_ref, b_ref, o_ref):
    # x_ref : (OBS_NUM, TB)        f32  -- batch on lanes
    # w1_ref: (HIDDEN, OBS_NUM)    f32  -- layer-1 weight, [out, in]
    # w_ref : (3, HIDDEN, HIDDEN)  f32  -- layers 2..4, [out, in] (layer-4 rows zero-padded)
    # b_ref : (4, HIDDEN, 1)       f32  -- biases as column vectors (layer-4 rows zero-padded)
    # o_ref : (ACT_NUM, TB)        f32
    xT = x_ref[...]                                             # (3, TB)

    # ---- Layer 1 on the MXU: (32,3) @ (3,TB) -> (32,TB). ----
    h = jnp.tanh(jnp.dot(w1_ref[...], xT,
                         preferred_element_type=jnp.float32) + b_ref[0])

    # ---- Layers 2 & 3: 32x32 MXU matmuls on lane-dense activations. ----
    h = jnp.tanh(jnp.dot(w_ref[0], h,
                         preferred_element_type=jnp.float32) + b_ref[1])
    h = jnp.tanh(jnp.dot(w_ref[1], h,
                         preferred_element_type=jnp.float32) + b_ref[2])

    # ---- Layer 4 (output rows padded to 32 sublanes) + sigmoid. ----
    logits = jnp.dot(w_ref[2], h,
                     preferred_element_type=jnp.float32) + b_ref[3]
    # sigmoid(x) = 0.5*(tanh(x/2)+1): stable, EUP-resident; computed on the full
    # padded (32, TB) block (padded sublanes live in the same vregs -> free),
    # sliced to ACT_NUM only at the final lane-dense store.
    sig = 0.5 * (jnp.tanh(0.5 * logits) + 1.0)
    o_ref[...] = sig[:ACT_NUM, :]


def _choose_tile(batch, block_cols):
    """Batch-tile width (lanes).  Multiple of 128; clamp so large batches give
    at least 2 grid steps (v7x megacore shards the 'parallel' axis)."""
    tb = min(_round_up(batch, LANE), _round_up(block_cols, LANE))
    padded = _round_up(batch, tb)
    if padded // tb < 2 and batch > LANE:
        tb = _round_up(-(-batch // 2), LANE)
        padded = _round_up(batch, tb)
    return tb, padded


def mlp_forward(x, w1, w_stack, b_stack, *, block_cols=4096):
    """x: [batch, OBS_NUM] f32 -> [batch, ACT_NUM] f32."""
    batch = x.shape[0]
    tb, padded = _choose_tile(batch, block_cols)

    # Layout plumbing in the wrapper: present a lane-dense (feat, batch) slab.
    xT = x.T                                                    # (OBS_NUM, batch)
    if padded != batch:
        xT = jnp.pad(xT, ((0, 0), (0, padded - batch)))

    out = pl.pallas_call(
        _mlp_kernel,
        out_shape=jax.ShapeDtypeStruct((ACT_NUM, padded), jnp.float32),
        grid_spec=pltpu.PrefetchScalarGridSpec(
            num_scalar_prefetch=0,
            grid=(padded // tb,),
            in_specs=[
                pl.BlockSpec((OBS_NUM, tb), lambda i: (0, i)),
                # Constant block indices -> params fetched once, VMEM-resident.
                pl.BlockSpec((HIDDEN, OBS_NUM), lambda i: (0, 0)),
                pl.BlockSpec((3, HIDDEN, HIDDEN), lambda i: (0, 0, 0)),
                pl.BlockSpec((4, HIDDEN, 1), lambda i: (0, 0, 0)),
            ],
            out_specs=pl.BlockSpec((ACT_NUM, tb), lambda i: (0, i)),
        ),
        compiler_params=pltpu.CompilerParams(
            dimension_semantics=("parallel",)),
    )(xT, w1, w_stack, b_stack)

    return out[:, :batch].T                                     # (batch, ACT_NUM)


def init_params(key):
    """PyTorch nn.Linear default init: U(-1/sqrt(fan_in), +1/sqrt(fan_in)).
    Weights stored in PyTorch's native [out, in] orientation."""
    dims = [(OBS_NUM, HIDDEN), (HIDDEN, HIDDEN), (HIDDEN, HIDDEN), (HIDDEN, ACT_NUM)]
    params = {}
    for i, (fan_in, fan_out) in enumerate(dims, start=1):
        key, kw, kb = jax.random.split(key, 3)
        bound = 1.0 / (fan_in ** 0.5)
        params[f"w{i}"] = jax.random.uniform(
            kw, (fan_out, fan_in), minval=-bound, maxval=bound, dtype=jnp.float32)
        params[f"b{i}"] = jax.random.uniform(
            kb, (fan_out,), minval=-bound, maxval=bound, dtype=jnp.float32)
    return params


def pack_params(params):
    """Pack params for the transposed kernel:
       w1      : (HIDDEN, OBS_NUM)     layer-1 weight as-is ([out, in])
       w_stack : (3, HIDDEN, HIDDEN)   layers 2..4 ([out, in]; layer-4 rows zero-padded)
       b_stack : (4, HIDDEN, 1)        biases as columns (layer-4 rows zero-padded)"""
    w1 = params["w1"]                                           # (32, 3)
    w = jnp.zeros((3, HIDDEN, HIDDEN), jnp.float32)
    w = w.at[0].set(params["w2"])
    w = w.at[1].set(params["w3"])
    w = w.at[2, :ACT_NUM, :].set(params["w4"])
    b = jnp.zeros((4, HIDDEN, 1), jnp.float32)
    b = b.at[0, :, 0].set(params["b1"])
    b = b.at[1, :, 0].set(params["b2"])
    b = b.at[2, :, 0].set(params["b3"])
    b = b.at[3, :ACT_NUM, 0].set(params["b4"])
    return w1, w, b


def _reference_forward(x, params):
    h = jnp.tanh(x @ params["w1"].T + params["b1"])
    h = jnp.tanh(h @ params["w2"].T + params["b2"])
    h = jnp.tanh(h @ params["w3"].T + params["b3"])
    return jax.nn.sigmoid(h @ params["w4"].T + params["b4"])


if __name__ == "__main__":
    key = jax.random.PRNGKey(0)
    key, kp = jax.random.split(key)
    params = init_params(kp)
    w1, w_stack, b_stack = pack_params(params)

    # Small spec-consistent batch, a non-divisible batch (padding + multi-step
    # grid), and a larger batch that exercises the >=2-step megacore clamp.
    for batch, block_cols in ((8, 256), (300, 128), (2048, 4096)):
        key, kx = jax.random.split(key)
        x = jax.random.normal(kx, (batch, OBS_NUM), dtype=jnp.float32)

        out = jax.block_until_ready(
            mlp_forward(x, w1, w_stack, b_stack, block_cols=block_cols))
        ref = _reference_forward(x, params)

        assert out.shape == (batch, ACT_NUM)
        err = float(jnp.max(jnp.abs(out - ref)))
        assert err < 2e-4, f"max abs err {err} (batch={batch})"

    print("KERNEL_OK")
</pallas_src>

<mosaic_0001>
module attributes {stable_mosaic.version = 11 : i64} {
  func.func @_mlp_kernel(%arg0: i32, %arg1: memref<3x128xf32, #tpu.memory_space<vmem>>, %arg2: memref<32x3xf32, #tpu.memory_space<vmem>>, %arg3: memref<3x32x32xf32, #tpu.memory_space<vmem>>, %arg4: memref<4x32x1xf32, #tpu.memory_space<vmem>>, %arg5: memref<3x128xf32, #tpu.memory_space<vmem>>) attributes {dimension_semantics = [#tpu.dimension_semantics<parallel>], iteration_bounds = array<i64: 1>, scalar_prefetch = 0 : i64, scratch_operands = 0 : i64, tpu.core_type = #tpu.core_type<tc>, window_params = [{transform_indices = @transform_0, window_bounds = array<i64: 3, 128>}, {pipeline_mode = #tpu.pipeline_mode<synchronous>, transform_indices = @transform_1, window_bounds = array<i64: 32, 3>}, {pipeline_mode = #tpu.pipeline_mode<synchronous>, transform_indices = @transform_2, window_bounds = array<i64: 3, 32, 32>}, {pipeline_mode = #tpu.pipeline_mode<synchronous>, transform_indices = @transform_3, window_bounds = array<i64: 4, 32, 1>}, {transform_indices = @transform_4, window_bounds = array<i64: 3, 128>}]} {
    %c0 = arith.constant 0 : index
    %c0_0 = arith.constant 0 : index
    %0 = vector.load %arg1[%c0, %c0_0] : memref<3x128xf32, #tpu.memory_space<vmem>>, vector<3x128xf32>
    %c0_1 = arith.constant 0 : index
    %c0_2 = arith.constant 0 : index
    %1 = vector.load %arg2[%c0_1, %c0_2] : memref<32x3xf32, #tpu.memory_space<vmem>>, vector<32x3xf32>
    %cst = arith.constant dense<0.000000e+00> : vector<32x128xf32>
    %2 = tpu.matmul %1, %0, %cst {dimension_numbers = #tpu.dot_dimension_numbers<[1], [0], [0], [1], [0, 0, 1, 1], [], []>} : vector<32x3xf32>, vector<3x128xf32>, vector<32x128xf32> -> vector<32x128xf32>
    %c0_3 = arith.constant 0 : index
    %c0_4 = arith.constant 0 : index
    %c0_5 = arith.constant 0 : index
    %3 = vector.load %arg4[%c0_3, %c0_4, %c0_5] : memref<4x32x1xf32, #tpu.memory_space<vmem>>, vector<1x32x1xf32>
    %4 = vector.shape_cast %3 : vector<1x32x1xf32> to vector<32x1xf32>
    %5 = vector.broadcast %4 : vector<32x1xf32> to vector<32x128xf32>
    %6 = arith.addf %2, %5 : vector<32x128xf32>
    %7 = math.tanh %6 : vector<32x128xf32>
    %c0_6 = arith.constant 0 : index
    %c0_7 = arith.constant 0 : index
    %c0_8 = arith.constant 0 : index
    %8 = vector.load %arg3[%c0_6, %c0_7, %c0_8] : memref<3x32x32xf32, #tpu.memory_space<vmem>>, vector<1x32x32xf32>
    %9 = vector.shape_cast %8 : vector<1x32x32xf32> to vector<32x32xf32>
    %cst_9 = arith.constant dense<0.000000e+00> : vector<32x128xf32>
    %10 = tpu.matmul %9, %7, %cst_9 {dimension_numbers = #tpu.dot_dimension_numbers<[1], [0], [0], [1], [0, 0, 1, 1], [], []>} : vector<32x32xf32>, vector<32x128xf32>, vector<32x128xf32> -> vector<32x128xf32>
    %c1 = arith.constant 1 : index
    %c0_10 = arith.constant 0 : index
    %c0_11 = arith.constant 0 : index
    %11 = vector.load %arg4[%c1, %c0_10, %c0_11] : memref<4x32x1xf32, #tpu.memory_space<vmem>>, vector<1x32x1xf32>
    %12 = vector.shape_cast %11 : vector<1x32x1xf32> to vector<32x1xf32>
    %13 = vector.broadcast %12 : vector<32x1xf32> to vector<32x128xf32>
    %14 = arith.addf %10, %13 : vector<32x128xf32>
    %15 = math.tanh %14 : vector<32x128xf32>
    %c1_12 = arith.constant 1 : index
    %c0_13 = arith.constant 0 : index
    %c0_14 = arith.constant 0 : index
    %16 = vector.load %arg3[%c1_12, %c0_13, %c0_14] : memref<3x32x32xf32, #tpu.memory_space<vmem>>, vector<1x32x32xf32>
    %17 = vector.shape_cast %16 : vector<1x32x32xf32> to vector<32x32xf32>
    %cst_15 = arith.constant dense<0.000000e+00> : vector<32x128xf32>
    %18 = tpu.matmul %17, %15, %cst_15 {dimension_numbers = #tpu.dot_dimension_numbers<[1], [0], [0], [1], [0, 0, 1, 1], [], []>} : vector<32x32xf32>, vector<32x128xf32>, vector<32x128xf32> -> vector<32x128xf32>
    %c2 = arith.constant 2 : index
    %c0_16 = arith.constant 0 : index
    %c0_17 = arith.constant 0 : index
    %19 = vector.load %arg4[%c2, %c0_16, %c0_17] : memref<4x32x1xf32, #tpu.memory_space<vmem>>, vector<1x32x1xf32>
    %20 = vector.shape_cast %19 : vector<1x32x1xf32> to vector<32x1xf32>
    %21 = vector.broadcast %20 : vector<32x1xf32> to vector<32x128xf32>
    %22 = arith.addf %18, %21 : vector<32x128xf32>
    %23 = math.tanh %22 : vector<32x128xf32>
    %c2_18 = arith.constant 2 : index
    %c0_19 = arith.constant 0 : index
    %c0_20 = arith.constant 0 : index
    %24 = vector.load %arg3[%c2_18, %c0_19, %c0_20] : memref<3x32x32xf32, #tpu.memory_space<vmem>>, vector<1x32x32xf32>
    %25 = vector.shape_cast %24 : vector<1x32x32xf32> to vector<32x32xf32>
    %cst_21 = arith.constant dense<0.000000e+00> : vector<32x128xf32>
    %26 = tpu.matmul %25, %23, %cst_21 {dimension_numbers = #tpu.dot_dimension_numbers<[1], [0], [0], [1], [0, 0, 1, 1], [], []>} : vector<32x32xf32>, vector<32x128xf32>, vector<32x128xf32> -> vector<32x128xf32>
    %c3 = arith.constant 3 : index
    %c0_22 = arith.constant 0 : index
    %c0_23 = arith.constant 0 : index
    %27 = vector.load %arg4[%c3, %c0_22, %c0_23] : memref<4x32x1xf32, #tpu.memory_space<vmem>>, vector<1x32x1xf32>
    %28 = vector.shape_cast %27 : vector<1x32x1xf32> to vector<32x1xf32>
    %29 = vector.broadcast %28 : vector<32x1xf32> to vector<32x128xf32>
    %30 = arith.addf %26, %29 : vector<32x128xf32>
    %cst_24 = arith.constant 5.000000e-01 : f32
    %31 = vector.broadcast %cst_24 : f32 to vector<32x128xf32>
    %32 = arith.mulf %31, %30 : vector<32x128xf32>
    %33 = math.tanh %32 : vector<32x128xf32>
    %cst_25 = arith.constant 1.000000e+00 : f32
    %34 = vector.broadcast %cst_25 : f32 to vector<32x128xf32>
    %35 = arith.addf %33, %34 : vector<32x128xf32>
    %cst_26 = arith.constant 5.000000e-01 : f32
    %36 = vector.broadcast %cst_26 : f32 to vector<32x128xf32>
    %37 = arith.mulf %36, %35 : vector<32x128xf32>
    %38 = vector.extract_strided_slice %37 {offsets = [0, 0], sizes = [3, 128], strides = [1, 1]} : vector<32x128xf32> to vector<3x128xf32>
    %c0_27 = arith.constant 0 : index
    %c0_28 = arith.constant 0 : index
    %39 = vector.load %arg5[%c0_27, %c0_28] : memref<3x128xf32, #tpu.memory_space<vmem>>, vector<3x128xf32>
    tpu.vector_store %arg5[%c0_27, %c0_28], %38 {strides = array<i32>} : memref<3x128xf32, #tpu.memory_space<vmem>>, vector<3x128xf32>,
    return
  }
  func.func @transform_0(%arg0: i32) -> (i32, i32) {
    %c0_i32 = arith.constant 0 : i32
    %c0_i32_0 = arith.constant 0 : i32
    return %c0_i32, %arg0 : i32, i32
  }
  func.func @transform_1(%arg0: i32) -> (i32, i32) {
    %c0_i32 = arith.constant 0 : i32
    %c0_i32_0 = arith.constant 0 : i32
    %c0_i32_1 = arith.constant 0 : i32
    return %c0_i32, %c0_i32_0 : i32, i32
  }
  func.func @transform_2(%arg0: i32) -> (i32, i32, i32) {
    %c0_i32 = arith.constant 0 : i32
    %c0_i32_0 = arith.constant 0 : i32
    %c0_i32_1 = arith.constant 0 : i32
    %c0_i32_2 = arith.constant 0 : i32
    return %c0_i32, %c0_i32_0, %c0_i32_1 : i32, i32, i32
  }
  func.func @transform_3(%arg0: i32) -> (i32, i32, i32) {
    %c0_i32 = arith.constant 0 : i32
    %c0_i32_0 = arith.constant 0 : i32
    %c0_i32_1 = arith.constant 0 : i32
    %c0_i32_2 = arith.constant 0 : i32
    return %c0_i32, %c0_i32_0, %c0_i32_1 : i32, i32, i32
  }
  func.func @transform_4(%arg0: i32) -> (i32, i32) {
    %c0_i32 = arith.constant 0 : i32
    %c0_i32_0 = arith.constant 0 : i32
    return %c0_i32, %arg0 : i32, i32
  }
}

</mosaic_0001>

<bundles_post_ra>
// kernel: tpu_custom_call.1
= control target key start
LH: loop header
LB: loop body
LE: loop exit
PB: predicated region body
PF: predicated region fallthrough
CT: control target
= control target key end

     0   :  { %vm60_vm0 = vcmask 1042432   ;;  %v427_v3 = vmov 0   ;;  %vm47_vm1 = vcmask 23552   ;;  %s563_s0 = inlined_call_operand.vmem [shape: f32[3,128], index: 0, kind: input, shape index: {}]   ;;  %s564_s1 = inlined_call_operand.vmem [shape: f32[32,3], index: 1, kind: input, shape index: {}]   ;;  %s565_s2 = inlined_call_operand.vmem [shape: f32[3,32,32], index: 2, kind: input, shape index: {}]   ;;  %s566_s3 = inlined_call_operand.vmem [shape: f32[4,32,1], index: 3, kind: input, shape index: {}]   ;;  %s567_s4 = inlined_call_operand.hbm [shape: f32[3,128], index: 4, kind: output, shape index: {}]  }
   0x1   :  { %v18_v0 = vld [vmem:[%s563_s0] sm:$0x7]  ;;  %v26_v1 = vld [vmem:[%s566_s3 + $0x18] sm:$0xff]  ;;  %372 = vset.pattern.permute.xlu0 %v427_v3  ;;  %v24_v4 = vld [vmem:[%s566_s3 + $0x8] sm:$0xff]  ;;  %373 = vset.pattern.permute.xlu1 %v427_v3 }
   0x2   :  { %v19_v2 = vld [vmem:[%s564_s1] sm:$0xff]  ;;  %333 = vmatpush.msk.msra.mxu0 %vm60_vm0, %v18_v0  ;;  %44 = vperm.xlu0 %372, %v26_v1  }
   0x3   :  { %334 = vmatmul.msk.f32.vlgmr.msra.gmra.mxu0 %vm47_vm1, %v19_v2  ;;  %374 = vset.pattern.permute.xlu2 %v427_v3 }
   0x4   :  { %34 = vperm.xlu1 %373, %v24_v4  }
   0x5   :  { %9 = vsyncpa [#allocation3], 0  ;;  %v25_v5 = vld [vmem:[%s566_s3 + $0x10] sm:$0xff]  ;;  %v20_v6 = vld [vmem:[%s564_s1 + $0x8] sm:$0xff]  ;;  %vm126_vm2 = vcmask 261120   ;;  %s428_s18 = smov [#allocation2]  }
   0x6   :  { %v23_v7 = vld [vmem:[%s566_s3] sm:$0xff]  ;;  %v339_v8 = vld [vmem:[%s566_s3 + $0x28] sm:$0xff]  ;;  %v21_v9 = vld [vmem:[%s564_s1 + $0x10] sm:$0xff]  ;;  %s322_s19 = sshll.u32 %s428_s18, 4  ;;  %s324_s22 = sshll.u32 %s567_s4, 4  ;;  %s323_s19 = int_to_ptr.vmem [resolvable:$true] %s322_s19  ;;  %s325_s22 = int_to_ptr.hbm [resolvable:$true] %s324_s22 }
   0x7   :  { %v338_v10 = vld [vmem:[%s566_s3 + $0x20] sm:$0xff]  ;;  %v352_v11 = vld [vmem:[%s566_s3 + $0x50] sm:$0xff]  ;;  %v22_v12 = vld [vmem:[%s564_s1 + $0x18] sm:$0xff] }
   0x8   :  { %v351_v13 = vld [vmem:[%s566_s3 + $0x48] sm:$0xff]  ;;  %v362_v14 = vld [vmem:[%s566_s3 + $0x60] sm:$0xff]  ;;  %v341_v28 = vld [vmem:[%s566_s3 + $0x38] sm:$0xff] }
   0x9   :  { %123 = vperm.xlu2 %374, %v341_v28   ;;  %v97_v31 = vld [vmem:[%s565_s2] sm:$0xff]  ;;  %v340_v33 = vld [vmem:[%s566_s3 + $0x30] sm:$0xff]  ;;  %v98_v34 = vld [vmem:[%s565_s2 + $0x8] sm:$0xff] }
   0xa   :  { %39 = vperm.xlu0 %372, %v25_v5   ;;  %v353_v35 = vld [vmem:[%s566_s3 + $0x58] sm:$0xff]  ;;  %v99_v36 = vld [vmem:[%s565_s2 + $0x10] sm:$0xff]  ;;  %v350_v37 = vld [vmem:[%s566_s3 + $0x40] sm:$0xff] }
   0xb   :  { %335 = vmatmul.msk.f32.gmra.mxu0 %vm47_vm1, %v20_v6  ;;  %v100_v38 = vld [vmem:[%s565_s2 + $0x18] sm:$0xff]  ;;  %v346_v54 = vld [vmem:[%s565_s2 + $0x20] sm:$0xff]  ;;  %v347_v56 = vld [vmem:[%s565_s2 + $0x28] sm:$0xff] }
   0xc   :  { %29 = vperm.xlu1 %373, %v23_v7   ;;  %v348_v57 = vld [vmem:[%s565_s2 + $0x30] sm:$0xff]  ;;  %v349_v58 = vld [vmem:[%s565_s2 + $0x38] sm:$0xff] }
  0x11   :  { %118 = vperm.xlu2 %374, %v340_v33  }
  0x12   :  { %113 = vperm.xlu0 %372, %v339_v8  }
  0x13   :  { %336 = vmatmul.msk.f32.gmra.mxu0 %vm47_vm1, %v21_v9 }
  0x14   :  { %108 = vperm.xlu1 %373, %v338_v10   ;;  %v358_v10 = vld [vmem:[%s565_s2 + $0x40] sm:$0xff] }
  0x19   :  { %199 = vperm.xlu2 %374, %v353_v35  }
  0x1a   :  { %194 = vperm.xlu0 %372, %v352_v11  }
  0x1b   :  { %337 = vmatmul.msk.f32.gmra.mxu0 %vm47_vm1, %v22_v12  ;;  %v359_v12 = vld [vmem:[%s565_s2 + $0x48] sm:$0xff] }
  0x1c   :  { %189 = vperm.xlu1 %373, %v351_v13   ;;  %v360_v13 = vld [vmem:[%s565_s2 + $0x50] sm:$0xff] }
  0x21   :  { %184 = vperm.xlu2 %374, %v350_v37  }
  0x22   :  { %259 = vperm.xlu0 %372, %v362_v14   ;;  %v361_v14 = vld [vmem:[%s565_s2 + $0x58] sm:$0xff] }
  0x63   :  { %v124_v41 = vpop.permute.xlu2 %123 }
  0x6b   :  { %v119_v43 = vpop.permute.xlu2 %118 }
  0x73   :  { %v200_v62 = vpop.permute.xlu2 %199 }
  0x74   :  { %v45_v17 = vpop.permute.xlu0 %44 }
  0x76   :  { %v35_v18 = vpop.permute.xlu1 %34 }
  0x7b   :  { %v185_v5 = vpop.permute.xlu2 %184 }
  0x7c   :  { %v40_v20 = vpop.permute.xlu0 %39 }
  0x7e   :  { %v30_v24 = vpop.permute.xlu1 %29 }
  0x80   :  { %v81_v15 = vpop.f32.mrf.mxu0 }
  0x81   :  { %v82_v26 = vadd.f32 %v81_v15, %v30_v24 }
  0x84   :  { %v114_v47 = vpop.permute.xlu0 %113 }
  0x86   :  { %v109_v49 = vpop.permute.xlu1 %108 }
  0x88   :  { %v84_v16 = vpop.f32.mrf.mxu0 }
  0x89   :  { %v85_v25 = vadd.f32 %v84_v16, %v35_v18 }
  0x8c   :  { %v195_v63 = vpop.permute.xlu0 %194 }
  0x8e   :  { %v190_v3 = vpop.permute.xlu1 %189 }
  0x90   :  { %v87_v19 = vpop.f32.mrf.mxu0 }
  0x91   :  { %v88_v22 = vadd.f32 %v87_v19, %v40_v20 }
  0x94   :  { %v260_v15 = vpop.permute.xlu0 %259 }
  0x98   :  { %v90_v21 = vpop.f32.mrf.mxu0 }
  0x99   :  { %v91_v23 = vadd.f32 %v90_v21, %v45_v17 }
  0x9b   :  { %375 = vtanh.f32 %v91_v23 }
  0x9c   :  { %377 = vtanh.f32 %v88_v22 }
  0x9d   :  { %379 = vtanh.f32 %v85_v25 }
  0x9e   :  { %381 = vtanh.f32 %v82_v26 }
  0xa1   :  { %v376_v27 = vpop.eup %375 }
  0xa2   :  { %151 = vmatpush.msra.mxu1 %v376_v27  ;;  %v378_v29 = vpop.eup %377 }
  0xa3   :  { %v380_v30 = vpop.eup %379 }
  0xa4   :  { %152 = vmatpush.msra.mxu1 %v378_v29  ;;  %v382_v32 = vpop.eup %381 }
  0xa6   :  { %153 = vmatpush.msra.mxu1 %v380_v30 }
  0xa8   :  { %154 = vmatpush.msra.mxu1 %v382_v32 }
  0xa9   :  { %342 = vmatmul.msk.f32.vlgmr.msra.gmra.mxu1 %vm126_vm2, %v97_v31 }
  0xb1   :  { %343 = vmatmul.msk.f32.gmra.mxu1 %vm126_vm2, %v98_v34 }
  0xb9   :  { %344 = vmatmul.msk.f32.gmra.mxu1 %vm126_vm2, %v99_v36 }
  0xc1   :  { %345 = vmatmul.msk.f32.gmra.mxu1 %vm126_vm2, %v100_v38 }
 0x126   :  { %v156_v39 = vpop.f32.mrf.mxu1 }
 0x127   :  { %v157_v50 = vadd.f32 %v156_v39, %v109_v49 }
 0x12e   :  { %v159_v40 = vpop.f32.mrf.mxu1 }
 0x12f   :  { %v160_v48 = vadd.f32 %v159_v40, %v114_v47 }
 0x136   :  { %v162_v42 = vpop.f32.mrf.mxu1 }
 0x137   :  { %v163_v45 = vadd.f32 %v162_v42, %v119_v43 }
 0x13e   :  { %v165_v44 = vpop.f32.mrf.mxu1 }
 0x13f   :  { %v166_v46 = vadd.f32 %v165_v44, %v124_v41 }
 0x141   :  { %383 = vtanh.f32 %v166_v46 }
 0x142   :  { %385 = vtanh.f32 %v163_v45 }
 0x143   :  { %387 = vtanh.f32 %v160_v48 }
 0x144   :  { %389 = vtanh.f32 %v157_v50 }
 0x147   :  { %v384_v51 = vpop.eup %383 }
 0x148   :  { %226 = vmatpush.msra.mxu2 %v384_v51  ;;  %v386_v52 = vpop.eup %385 }
 0x149   :  { %v388_v53 = vpop.eup %387 }
 0x14a   :  { %227 = vmatpush.msra.mxu2 %v386_v52  ;;  %v390_v55 = vpop.eup %389 }
 0x14c   :  { %228 = vmatpush.msra.mxu2 %v388_v53 }
 0x14e   :  { %229 = vmatpush.msra.mxu2 %v390_v55 }
 0x14f   :  { %354 = vmatmul.msk.f32.vlgmr.msra.gmra.mxu2 %vm126_vm2, %v346_v54 }
 0x157   :  { %355 = vmatmul.msk.f32.gmra.mxu2 %vm126_vm2, %v347_v56 }
 0x15f   :  { %356 = vmatmul.msk.f32.gmra.mxu2 %vm126_vm2, %v348_v57 }
 0x167   :  { %357 = vmatmul.msk.f32.gmra.mxu2 %vm126_vm2, %v349_v58 }
 0x1d2   :  { %v231_v59 = vpop.f32.mrf.mxu2 }
 0x1d3   :  { %v232_v6 = vadd.f32 %v231_v59, %v185_v5 }
 0x1da   :  { %v234_v60 = vpop.f32.mrf.mxu2 }
 0x1db   :  { %v235_v4 = vadd.f32 %v234_v60, %v190_v3 }
 0x1e2   :  { %v237_v61 = vpop.f32.mrf.mxu2 }
 0x1e3   :  { %v238_v1 = vadd.f32 %v237_v61, %v195_v63 }
 0x1ea   :  { %v240_v0 = vpop.f32.mrf.mxu2 }
 0x1eb   :  { %v241_v2 = vadd.f32 %v240_v0, %v200_v62 }
 0x1ed   :  { %391 = vtanh.f32 %v241_v2 }
 0x1ee   :  { %393 = vtanh.f32 %v238_v1 }
 0x1ef   :  { %395 = vtanh.f32 %v235_v4 }
 0x1f0   :  { %397 = vtanh.f32 %v232_v6 }
 0x1f3   :  { %v392_v7 = vpop.eup %391 }
 0x1f4   :  { %298 = vmatpush.msra.mxu3 %v392_v7  ;;  %v394_v8 = vpop.eup %393 }
 0x1f5   :  { %v396_v9 = vpop.eup %395 }
 0x1f6   :  { %299 = vmatpush.msra.mxu3 %v394_v8  ;;  %v398_v11 = vpop.eup %397 }
 0x1f8   :  { %300 = vmatpush.msra.mxu3 %v396_v9 }
 0x1fa   :  { %301 = vmatpush.msra.mxu3 %v398_v11 }
 0x1fb   :  { %366 = vmatmul.msk.f32.vlgmr.msra.gmra.mxu3 %vm126_vm2, %v358_v10 }
 0x203   :  { %367 = vmatmul.msk.f32.gmra.mxu3 %vm126_vm2, %v359_v12 }
 0x20b   :  { %368 = vmatmul.msk.f32.gmra.mxu3 %vm126_vm2, %v360_v13 }
 0x213   :  { %369 = vmatmul.msk.f32.gmra.mxu3 %vm126_vm2, %v361_v14 }
 0x27e   :  { %v303_v16 = vpop.f32.mrf.mxu3 }
 0x27f   :  { %v304_v17 = vadd.f32 %v303_v16, %v260_v15 }
 0x281   :  { %v312_v18 = vmul.f32 0.5, %v304_v17 }
 0x283   :  { %399 = vtanh.f32 %v312_v18 }
 0x286   :  { %v306_v19 = vpop.f32.mrf.mxu3 }
 0x289   :  { %v400_v20 = vpop.eup %399 }
 0x28a   :  { %v314_v21 = vadd.f32 1.0, %v400_v20 }
 0x28c   :  { %v315_v22 = vmul.f32 0.5, %v314_v21 }
 0x28e   :  { %316 = vst [vmem:[#allocation2] sm:$0x7] %v315_v22  ;;  %v308_v23 = vpop.f32.mrf.mxu3 }
 0x28f   :  { %327 = dma.vmem_to_hbm [thread:$0]  %s323_s19, 64, %s325_s22, [#allocation3]  }
 0x296   :  { %v310_v24 = vpop.f32.mrf.mxu3 }
 0x297   :  { %425 = dma.done.wait [#allocation3], 64  }
 0x298   :  { %426 = vsyncadd [#allocation3], 4294967232 }
 0x299   :  { %332 = vsyncpa [#allocation3], 1 }

</bundles_post_ra>
